<compile_context>
chip_gen: v6e
topology: v6e:2x2x1
jax: 0.10.0
libtpu: 0.0.40
codegen_flags: <defaults>
</compile_context>

<pallas_src>
import functools

import jax
import jax.numpy as jnp
from jax.experimental import pallas as pl
from jax.experimental.pallas import tpu as pltpu

IN_FEATURES = 29
OUT_FEATURES = 1
_LANE = 128


def _round_up(n, m):
    return (n + m - 1) // m * m


def linear_sigmoid_kernel(x_ref, w_ref, b_ref, o_ref):
    # x_ref: (TB, F) VMEM tile, w_ref: (1, F) VMEM, b_ref: (1,) SMEM, o_ref: (1, TB) VMEM
    x = x_ref[...]                        # (TB, F)
    w = w_ref[...]                        # (1, F)
    # (1, F) x (TB, F) contracted over F -> (1, TB); batch lands on lanes (lane-dense).
    z = jax.lax.dot_general(
        w, x,
        dimension_numbers=(((1,), (1,)), ((), ())),
        preferred_element_type=jnp.float32,
    )
    z = z + b_ref[0]                      # scalar bias straight from SMEM
    o_ref[...] = jax.nn.sigmoid(z).astype(o_ref.dtype)


@functools.partial(jax.jit, static_argnames=("block_b",))
def net_forward(x, weight, bias, *, block_b=4096):
    """x: (B, 29) f32, weight: (1, 29) f32 (PyTorch layout), bias: (1,) f32 -> (B, 1)."""
    B = x.shape[0]
    # Pad batch to a lane multiple so every tile (incl. the output lane dim) is dense.
    b_pad = _round_up(max(B, _LANE), _LANE)
    if b_pad != B:
        x = jnp.pad(x, ((0, b_pad - B), (0, 0)))
    tb = min(block_b, b_pad)              # rows per grid step (multiple of 128)
    grid = (b_pad // tb,)                 # 2 x (tb*128*4B) double-buffered input tile
                                          # stays well under v5e 16MiB / v7x 32MiB scoped VMEM

    out_t = pl.pallas_call(
        linear_sigmoid_kernel,
        out_shape=jax.ShapeDtypeStruct((1, b_pad), jnp.float32),
        grid_spec=pl.GridSpec(
            grid=grid,
            in_specs=[
                # batch-tiled input: software-pipelined (prefetch i+1 while computing i)
                pl.BlockSpec((tb, IN_FEATURES), lambda i: (i, 0)),
                # weight: one small VMEM block, identical for every grid step
                pl.BlockSpec((OUT_FEATURES, IN_FEATURES), lambda i: (0, 0)),
                # bias: single scalar kept in SMEM (no per-step VMEM stream / broadcast)
                pl.BlockSpec(memory_space=pltpu.MemorySpace.SMEM),
            ],
            # lane-dense output: last dim = tb (multiple of 128) -> unmasked vst
            out_specs=pl.BlockSpec((1, tb), lambda i: (0, i)),
        ),
        compiler_params=pltpu.CompilerParams(
            # batch axis is embarrassingly parallel; shards across both TCs on v7x,
            # neutral on v5e/v6e.
            dimension_semantics=("parallel",),
        ),
        cost_estimate=pl.CostEstimate(
            flops=2 * b_pad * IN_FEATURES,
            transcendentals=b_pad,
            bytes_accessed=b_pad * IN_FEATURES * 4 + b_pad * 4 + IN_FEATURES * 4 + 4,
        ),
    )(x, weight, bias)

    # (1, B_pad) -> (B, 1): trivial relayout of 4*B bytes, matches PyTorch output shape.
    return out_t.reshape(b_pad, 1)[:B]


if __name__ == "__main__":
    key = jax.random.PRNGKey(0)
    kx, kw, kb = jax.random.split(key, 3)

    B = 512  # small demo batch; with block_b=128 this runs a 4-step pipelined grid
    x = jax.random.normal(kx, (B, IN_FEATURES), dtype=jnp.float32)

    # Deterministic parameter init (mimics torch.nn.Linear uniform(-1/sqrt(fan_in), ...))
    bound = 1.0 / jnp.sqrt(jnp.float32(IN_FEATURES))
    weight = jax.random.uniform(kw, (OUT_FEATURES, IN_FEATURES),
                                minval=-bound, maxval=bound, dtype=jnp.float32)
    bias = jax.random.uniform(kb, (OUT_FEATURES,),
                              minval=-bound, maxval=bound, dtype=jnp.float32)

    out = net_forward(x, weight, bias, block_b=128)
    out = jax.block_until_ready(out)

    # Reference check in plain JAX
    ref = jax.nn.sigmoid(x @ weight.T + bias)
    assert out.shape == (B, OUT_FEATURES)
    assert jnp.allclose(out, ref, atol=1e-5), "mismatch vs reference"

    print("KERNEL_OK")
</pallas_src>

<mosaic_0001>
module attributes {stable_mosaic.version = 11 : i64} {
  func.func @linear_sigmoid_kernel(%arg0: i32, %arg1: memref<128x29xf32, #tpu.memory_space<vmem>>, %arg2: memref<1x29xf32, #tpu.memory_space<vmem>>, %arg3: memref<1xf32, #tpu.memory_space<smem>>, %arg4: memref<1x128xf32, #tpu.memory_space<vmem>>) attributes {dimension_semantics = [#tpu.dimension_semantics<parallel>], iteration_bounds = array<i64: 4>, scalar_prefetch = 0 : i64, scratch_operands = 0 : i64, tpu.core_type = #tpu.core_type<tc>, window_params = [{transform_indices = @transform_0, window_bounds = array<i64: 128, 29>}, {pipeline_mode = #tpu.pipeline_mode<synchronous>, transform_indices = @transform_1, window_bounds = array<i64: 1, 29>}, {transform_indices = @transform_2, window_bounds = array<i64: 1>}, {transform_indices = @transform_3, window_bounds = array<i64: 1, 128>}]} {
    %c0 = arith.constant 0 : index
    %c0_0 = arith.constant 0 : index
    %0 = vector.load %arg1[%c0, %c0_0] : memref<128x29xf32, #tpu.memory_space<vmem>>, vector<128x29xf32>
    %c0_1 = arith.constant 0 : index
    %c0_2 = arith.constant 0 : index
    %1 = vector.load %arg2[%c0_1, %c0_2] : memref<1x29xf32, #tpu.memory_space<vmem>>, vector<1x29xf32>
    %cst = arith.constant dense<0.000000e+00> : vector<1x128xf32>
    %2 = tpu.matmul %1, %0, %cst {dimension_numbers = #tpu.dot_dimension_numbers<[1], [1], [0], [0], [0, 0, 1, 0], [], []>} : vector<1x29xf32>, vector<128x29xf32>, vector<1x128xf32> -> vector<1x128xf32>
    %c0_3 = arith.constant 0 : index
    %3 = memref.load %arg3[%c0_3] : memref<1xf32, #tpu.memory_space<smem>>
    %4 = vector.broadcast %3 : f32 to vector<1x128xf32>
    %5 = arith.addf %2, %4 : vector<1x128xf32>
    %6 = arith.negf %5 : vector<1x128xf32>
    %7 = math.exp %6 : vector<1x128xf32>
    %cst_4 = arith.constant 1.000000e+00 : f32
    %8 = vector.broadcast %cst_4 : f32 to vector<1x128xf32>
    %9 = arith.addf %8, %7 : vector<1x128xf32>
    %10 = arith.divf %8, %9 : vector<1x128xf32>
    %c0_5 = arith.constant 0 : index
    %c0_6 = arith.constant 0 : index
    %11 = vector.load %arg4[%c0_5, %c0_6] : memref<1x128xf32, #tpu.memory_space<vmem>>, vector<1x128xf32>
    tpu.vector_store %arg4[%c0_5, %c0_6], %10 {strides = array<i32>} : memref<1x128xf32, #tpu.memory_space<vmem>>, vector<1x128xf32>,
    return
  }
  func.func @transform_0(%arg0: i32) -> (i32, i32) {
    %c0_i32 = arith.constant 0 : i32
    %c0_i32_0 = arith.constant 0 : i32
    return %arg0, %c0_i32 : i32, i32
  }
  func.func @transform_1(%arg0: i32) -> (i32, i32) {
    %c0_i32 = arith.constant 0 : i32
    %c0_i32_0 = arith.constant 0 : i32
    %c0_i32_1 = arith.constant 0 : i32
    return %c0_i32, %c0_i32_0 : i32, i32
  }
  func.func @transform_2(%arg0: i32) -> i32 {
    %c0_i32 = arith.constant 0 : i32
    %c0_i32_0 = arith.constant 0 : i32
    return %c0_i32 : i32
  }
  func.func @transform_3(%arg0: i32) -> (i32, i32) {
    %c0_i32 = arith.constant 0 : i32
    %c0_i32_0 = arith.constant 0 : i32
    return %c0_i32, %arg0 : i32, i32
  }
}

</mosaic_0001>

<bundles_post_ra>
// kernel: net_forward.1
= control target key start
LH: loop header
LB: loop body
LE: loop exit
PB: predicated region body
PF: predicated region fallthrough
CT: control target
= control target key end

     0   :  { %s729_s0 = inlined_call_operand.vmem [shape: f32[512,29], index: 0, kind: input, shape index: {}]   ;;  %s730_s1 = inlined_call_operand.vmem [shape: f32[1,29], index: 1, kind: input, shape index: {}]   ;;  %s731_s2 = inlined_call_operand.<no memory space> [shape: f32[1], index: 2, kind: input, shape index: {}]   ;;  %s732_s3 = inlined_call_operand.hbm [shape: f32[1,512], index: 3, kind: output, shape index: {}]  }
   0x1   :  { %8 = sst [smem:[#allocation2]] %s731_s2 }
   0x2   :  { %9 = vsyncpa [#allocation4], 0 }
   0x3   :  { %11 = vsyncpa [#allocation4 + $0x1], 0  ;;  %s599_s14 = smov 0   ;;  %s601_s15 = smov 0  }
   0x4   :  { %s603_s16 = smov 0   ;;  %s605_s17 = smov 0  }
   0x5 LB: > { %s386_s2 = sadd.s32 4294967295, %s571_s17   ;;  %s387_s18 = sadd.s32 4294967294, %s571_s17   ;;  %s571_s17 = sphi %s605_s17, %s738_s17   ;;  %s567_s16 = sphi %s603_s16, %s737_s16   ;;  %s563_s15 = sphi %s601_s15, %s736_s15   ;;  %s559_s14 = sphi %s599_s14, %s735_s14  }
   0x6   : > { %s622_s19 = sadd.s32 1, %s571_s17   ;;  %s92_s20 = sadd.s32 1, %s567_s16 }
   0x7   : > { %s89_s21 = ssub.s32 %s571_s17, %s622_s19  ;;  %p102_p0 = scmp.ne.s32.totalorder %s567_s16, %s563_s15 }
   0x8   : > { %p90_p1 = scmp.eq.s32.totalorder %s89_s21, 0  ;;  %p103_p2 = scmp.eq.s32.totalorder %s386_s2, 3 }
   0x9   : > { %p108_p3 = scmp.ne.s32.totalorder %s563_s15, %s559_s14  ;;  %p109_p4 = scmp.eq.s32.totalorder %s387_s18, 3 }
   0xa   : > { %s632_s22 = scalar_select %p90_p1, %s567_s16, %s92_s20  }
   0xb   : > { %p634_p5 = por %p103_p2, %p102_p0  ;;  %p638_p6 = por %p109_p4, %p108_p3 }
   0xc   : > { %p390_p7 = scmp.ge.s32.totalorder %s571_s17, 1  ;;  %p142_p8 = scmp.lt.s32.totalorder %s571_s17, 5 }
   0xe   : > { %p143_p9 = pnand %p390_p7, %p142_p8 }
   0xf   : > { %s644_s25 = sshll.u32 (!%p143_p9), %s386_s2, 4  ;;  %s188_s6 = sld [smem:[#allocation2]] (!%p143_p9) }
  0x10   : > { %146 = sbr.rel (%p143_p9) target bundleno = 329 (0x149), region = 32  ;;  %p166_p10 = scmp.lt.s32.totalorder (!%p143_p9), %s644_s25, 63 }
  0x11   : > { %s163_s7 = sand.u32 (!%p143_p9), 1, %s563_s15   ;;  %s694_s12 = scalar_lea.hbm (!%p143_p9), %s732_s3, %s644_s25 }
  0x12   : > { %s164_s8 = scalar_lea.vmem (!%p143_p9), [#allocation3], %s163_s7  ;;  %s320_s13 = scalar_lea.sflag (!%p143_p9), [#allocation4], %s163_s7 }
  0x13   : > { %s332_s9 = sshll.u32 (!%p143_p9), %s164_s8, 4  ;;  %s575_s18 = smov (!%p143_p9), [#allocation3]   ;;  %s333_s9 = int_to_ptr.vmem [resolvable:$true] %s332_s9 }
  0x14   : > { %s511_s2 = scalar_lea.vmem (!%p143_p9), %s333_s9, 16  ;;  %s515_s20 = sshll.u32 (!%p143_p9), %s575_s18, 4  ;;  %s516_s20 = int_to_ptr.vmem [resolvable:$false] %s515_s20 }
  0x15   : > { %v573_v0 = vmov 0.0   ;;  %vm574_vm0 = vmmov 0   ;;  %s167_s26 = scalar_select %p166_p10, %s644_s25, 63  ;;  %vm190_vm1 = vcmask 236544   ;;  %v187_v17 = vld [vmem:[%s730_s1] sm:$0x1]  ;;  %v189_v18 = vstv %s188_s6 }
  0x16   : > { %431 = vmatprep.subr.mxu0 %v573_v0  ;;  %463 = vmatprep.mubr.msk.f32.mxu0 %vm574_vm0, %v573_v0  ;;  %p512_p11 = scmp.ne.s32.totalorder %s333_s9, %s511_s2  ;;  %s517_s21 = scalar_lea.vmem %s516_s20, 32 }
  0x17   : > { %s392_s27 = sshll.u32 %s167_s26, 3  ;;  %p518_p0 = scmp.lt.s32.totalorder %s333_s9, %s516_s20 }
  0x18   : > { %s651_s30 = scalar_lea.vmem %s729_s0, %s392_s27  ;;  %p513_p12 = pnand %p512_p11, %p634_p5 }
  0x19   : > { %v186_v1 = vld [vmem:[%s651_s30 + $0x78] sm:$0xff]  ;;  %v185_v2 = vld [vmem:[%s651_s30 + $0x70] sm:$0xff]  ;;  %v184_v3 = vld [vmem:[%s651_s30 + $0x68] sm:$0xff]  ;;  %p519_p1 = scmp.lt.s32.totalorder %s517_s21, %s511_s2 }
  0x1a   : > { %432 = vmatpush3.xpose.msk.msra.mxu0 %vm190_vm1, %v186_v1  ;;  %v183_v4 = vld [vmem:[%s651_s30 + $0x60] sm:$0xff]  ;;  %v182_v5 = vld [vmem:[%s651_s30 + $0x58] sm:$0xff]  ;;  %v181_v6 = vld [vmem:[%s651_s30 + $0x50] sm:$0xff]  ;;  %p514_p13 = pneg %p513_p12 }
  0x1b   : > { %433 = vmatprep.subr.mxu0 %v573_v0  ;;  %v180_v7 = vld [vmem:[%s651_s30 + $0x48] sm:$0xff]  ;;  %v179_v8 = vld [vmem:[%s651_s30 + $0x40] sm:$0xff]  ;;  %v178_v9 = vld [vmem:[%s651_s30 + $0x38] sm:$0xff]  ;;  %p520_p2 = por %p519_p1, %p518_p0 }
  0x1c   : > { %v177_v10 = vld [vmem:[%s651_s30 + $0x30] sm:$0xff]  ;;  %v176_v11 = vld [vmem:[%s651_s30 + $0x28] sm:$0xff]  ;;  %v175_v12 = vld [vmem:[%s651_s30 + $0x20] sm:$0xff] }
  0x1d   : > { %v174_v13 = vld [vmem:[%s651_s30 + $0x18] sm:$0xff]  ;;  %v173_v14 = vld [vmem:[%s651_s30 + $0x10] sm:$0xff]  ;;  %v172_v15 = vld [vmem:[%s651_s30 + $0x8] sm:$0xff]  ;;  %p521_p3 = pnand %p520_p2, %p514_p13 }
  0x1e   : > { %434 = vmatpush3.xpose.msk.msra.mxu0 %vm190_vm1, %v185_v2  ;;  %v171_v16 = vld [vmem:[%s651_s30] sm:$0xff] }
  0x1f   : > { %435 = vmatprep.subr.mxu0 %v573_v0 }
  0x22   : > { %436 = vmatpush3.xpose.msk.msra.mxu0 %vm190_vm1, %v184_v3 }
  0x23   : > { %437 = vmatprep.subr.mxu0 %v573_v0 }
  0x26   : > { %438 = vmatpush3.xpose.msk.msra.mxu0 %vm190_vm1, %v183_v4 }
  0x27   : > { %439 = vmatprep.subr.mxu0 %v573_v0 }
  0x2a   : > { %440 = vmatpush3.xpose.msk.msra.mxu0 %vm190_vm1, %v182_v5 }
  0x2b   : > { %441 = vmatprep.subr.mxu0 %v573_v0 }
  0x2e   : > { %442 = vmatpush3.xpose.msk.msra.mxu0 %vm190_vm1, %v181_v6 }
  0x2f   : > { %443 = vmatprep.subr.mxu0 %v573_v0 }
  0x32   : > { %444 = vmatpush3.xpose.msk.msra.mxu0 %vm190_vm1, %v180_v7 }
  0x33   : > { %445 = vmatprep.subr.mxu0 %v573_v0 }
  0x36   : > { %446 = vmatpush3.xpose.msk.msra.mxu0 %vm190_vm1, %v179_v8 }
  0x37   : > { %447 = vmatprep.subr.mxu0 %v573_v0 }
  0x3a   : > { %448 = vmatpush3.xpose.msk.msra.mxu0 %vm190_vm1, %v178_v9 }
  0x3b   : > { %449 = vmatprep.subr.mxu0 %v573_v0 }
  0x3e   : > { %450 = vmatpush3.xpose.msk.msra.mxu0 %vm190_vm1, %v177_v10 }
  0x3f   : > { %451 = vmatprep.subr.mxu0 %v573_v0 }
  0x42   : > { %452 = vmatpush3.xpose.msk.msra.mxu0 %vm190_vm1, %v176_v11 }
  0x43   : > { %453 = vmatprep.subr.mxu0 %v573_v0 }
  0x46   : > { %454 = vmatpush3.xpose.msk.msra.mxu0 %vm190_vm1, %v175_v12 }
  0x47   : > { %455 = vmatprep.subr.mxu0 %v573_v0 }
  0x4a   : > { %456 = vmatpush3.xpose.msk.msra.mxu0 %vm190_vm1, %v174_v13 }
  0x4b   : > { %457 = vmatprep.subr.mxu0 %v573_v0 }
  0x4e   : > { %458 = vmatpush3.xpose.msk.msra.mxu0 %vm190_vm1, %v173_v14 }
  0x4f   : > { %459 = vmatprep.subr.mxu0 %v573_v0 }
  0x52   : > { %460 = vmatpush3.xpose.msk.msra.mxu0 %vm190_vm1, %v172_v15 }
  0x53   : > { %461 = vmatprep.subr.mxu0 %v573_v0 }
  0x56   : > { %462 = vmatpush3.xpose.msk.msra.mxu0 %vm190_vm1, %v171_v16 }
  0x59   : > { %464 = vmatmul.mubr.msk.f32.vlgmr.msra.gmra.mxu0 %vm190_vm1, %v187_v17 }
 0x119   : > { %v308_v19 = vpop.f32.mrf.mxu0 }
 0x11a   : > { %v309_v20 = vadd.f32 %v308_v19, %v189_v18 }
 0x11b   : > { %v465_v21 = vpop.f32.mrf.mxu0 }
 0x11c   : > { %v410_v22 = vmul.f32 -1.442695, %v309_v20 }
 0x11e   : > { %507 = vpow2.f32 %v410_v22 }
 0x12b   : > { %v508_v23 = vpop.eup %507 }
 0x12c   : > { %v315_v24 = vadd.f32 1.0, %v508_v23 }
 0x12e   : > { %509 = vrcp.f32 %v315_v24 }
 0x13b   : > { %v510_v25 = vpop.eup %509 }
 0x13c   : > { %318 = vst [vmem:[%s164_s8] sm:$0x1] %v510_v25 }
 0x13d   : > { %524 = shalt.err (!%p521_p3)
}
 0x13e   : > { %s525_s25 = scalar_lea.hbm %s694_s12, 16  ;;  %s529_s28 = scalar_lea.hbm %s732_s3, 64 }
 0x13f   : > { %p526_p4 = scmp.ne.s32.totalorder %s694_s12, %s525_s25  ;;  %p530_p9 = scmp.lt.s32.totalorder %s694_s12, %s732_s3 }
 0x140   : > { %p531_p10 = scmp.lt.s32.totalorder %s529_s28, %s525_s25 }
 0x141   : > { %p527_p7 = pnand %p526_p4, %p634_p5 }
 0x142   : > { %p532_p11 = por %p531_p10, %p530_p9 }
 0x143   : > { %p528_p8 = pneg %p527_p7 }
 0x145   : > { %p533_p12 = pnand %p532_p11, %p528_p8 }
 0x147   : > { %536 = shalt.err (!%p533_p12)
}
 0x148   : > { %466 = dma.vmem_to_hbm [thread:$0]  (%p634_p5), %s333_s9, 16, %s694_s12, %s320_s13  }
 0x149 PF: > { %p472_p13 = scmp.ge.s32.totalorder %s571_s17, 2  ;;  %s344_s4 = sand.u32 1, %s559_s14  }
 0x14a   : > { %s345_s5 = scalar_lea.sflag [#allocation4], %s344_s4 }
 0x14b   : > { %p469_p0 = pnand %p472_p13, %p638_p6 }
 0x14d   : > { %p470_p1 = pneg %p469_p0 }
 0x14f   : > { %554 = dma.done.wait (%p470_p1), %s345_s5, 16  }
 0x150   : > { %556 = vsyncadd (%p470_p1), %s345_s5, 4294967280  ;;  %p14_p2 = scmp.ge.s32.totalorder %s622_s19, 6   ;;  %s735_s14 = smov %s563_s15 }
 0x151   : > { %s736_s15 = smov %s567_s16  ;;  %s737_s16 = smov %s632_s22 }
 0x152   : > { %s738_s17 = smov %s622_s19  ;;  %16 = sbr.rel (!%p14_p2) target bundleno = 5 (0x5), region = 67 }
 0x157   :  { %349 = vsyncpa [#allocation4], 1 }
 0x158   :  { %351 = vsyncpa [#allocation4 + $0x1], 1 }

</bundles_post_ra>
